<compile_context>
chip_gen: v6e
topology: v6e:2x2x1
jax: 0.10.0
libtpu: 0.0.40
codegen_flags: <defaults>
</compile_context>

<pallas_src>
import jax
import jax.numpy as jnp
from jax.experimental import pallas as pl
from jax.experimental.pallas import tpu as pltpu


def _square_kernel(x_ref, o_ref):
    # Elementwise hot path: one VPU pass over the whole VMEM block.
    x = x_ref[...]
    o_ref[...] = x * x


# Widest lane-dense layouts first: a wide last dim keeps stores unmasked and
# minimizes DMA descriptors / grid steps.
_WIDTH_CANDIDATES = (4096, 2048, 1024, 512, 256, 128)


def _sublane_multiple(itemsize: int) -> int:
    # Packed dtypes pack along sublanes: f32 -> 8, bf16 -> 16, int8/fp8 -> 32.
    return max(8, 8 * (4 // max(1, itemsize)))


def _device_kind() -> str:
    try:
        return jax.devices()[0].device_kind.lower()
    except Exception:  # pragma: no cover - defensive, e.g. no devices yet
        return ""


def _default_block_bytes() -> int:
    kind = _device_kind()
    # v6e / v7x: 32 MiB default scoped VMEM -> 4 MiB blocks (in+out double
    # buffered = 16 MiB resident, comfortable headroom).  v5e (16 MiB scoped
    # default) and unknown chips: 2 MiB blocks (8 MiB resident).
    if ("v6" in kind) or ("v7" in kind):
        return 4 * 1024 * 1024
    return 2 * 1024 * 1024


def _min_grid_steps(total_bytes: int) -> int:
    # v7x has 2 TensorCores per chip; give each TC work whenever the slab is
    # non-trivial.  On v5e/v6e (1 TC) this is a measured no-op, so skip it.
    kind = _device_kind()
    if "v7" in kind and total_bytes > (1 << 20):
        return 2
    return 1


def _pick_tile_rows(rows: int, width: int, itemsize: int,
                    target_block_bytes: int, min_steps: int) -> int:
    sub = _sublane_multiple(itemsize)
    # ~target_block_bytes per block, rounded down to the packed sublane tile.
    tile_rows = (target_block_bytes // (width * itemsize)) // sub * sub
    tile_rows = max(sub, tile_rows)
    if tile_rows >= rows:
        # A block covering the full (possibly ragged) row extent is always legal.
        tile_rows = rows
    # Guarantee >= min_steps grid steps (v7x: feed both TensorCores).
    if min_steps > 1 and rows > sub:
        cap = pl.cdiv(pl.cdiv(rows, min_steps), sub) * sub
        tile_rows = min(tile_rows, max(sub, cap))
    # Prefer a tile_rows that divides rows exactly: a ragged final grid step
    # wastes DMA + masked stores, which is visible when the grid is short.
    if 0 < tile_rows < rows and rows % tile_rows != 0:
        cand = tile_rows - sub
        while cand >= max(sub, tile_rows // 2):
            if rows % cand == 0:
                tile_rows = cand
                break
            cand -= sub
    return max(1, tile_rows)


def _launch_2d(x2d: jax.Array, tile_rows: int) -> jax.Array:
    rows, width = x2d.shape
    itemsize = jnp.dtype(x2d.dtype).itemsize
    n = rows * width
    grid = (pl.cdiv(rows, tile_rows),)
    return pl.pallas_call(
        _square_kernel,
        out_shape=jax.ShapeDtypeStruct((rows, width), x2d.dtype),
        grid_spec=pltpu.PrefetchScalarGridSpec(
            num_scalar_prefetch=0,
            grid=grid,
            in_specs=[pl.BlockSpec((tile_rows, width), lambda i: (i, 0))],
            out_specs=pl.BlockSpec((tile_rows, width), lambda i: (i, 0)),
        ),
        compiler_params=pltpu.CompilerParams(
            dimension_semantics=("parallel",)
        ),
        cost_estimate=pl.CostEstimate(
            flops=n, transcendentals=0, bytes_accessed=2 * n * itemsize
        ),
    )(x2d)


def _launch_1d(x1d: jax.Array, block: int) -> jax.Array:
    n = x1d.shape[0]
    itemsize = jnp.dtype(x1d.dtype).itemsize
    grid = (pl.cdiv(n, block),)
    return pl.pallas_call(
        _square_kernel,
        out_shape=jax.ShapeDtypeStruct((n,), x1d.dtype),
        grid_spec=pltpu.PrefetchScalarGridSpec(
            num_scalar_prefetch=0,
            grid=grid,
            in_specs=[pl.BlockSpec((block,), lambda i: (i,))],
            out_specs=pl.BlockSpec((block,), lambda i: (i,)),
        ),
        compiler_params=pltpu.CompilerParams(
            dimension_semantics=("parallel",)
        ),
        cost_estimate=pl.CostEstimate(
            flops=n, transcendentals=0, bytes_accessed=2 * n * itemsize
        ),
    )(x1d)


def square(x: jax.Array, *, target_block_bytes: int | None = None) -> jax.Array:
    """Pointwise square of x (any shape/dtype), computed in a Pallas kernel."""
    orig_shape = x.shape
    n = x.size
    if n == 0:
        return x
    dtype = x.dtype
    itemsize = jnp.dtype(dtype).itemsize
    if target_block_bytes is None:
        target_block_bytes = _default_block_bytes()
    min_steps = _min_grid_steps(n * itemsize)

    # Fast path: element count divisible by a wide lane-dense width -> no pad,
    # no slice, just free reshapes around the kernel.
    width = None
    for w in _WIDTH_CANDIDATES:
        if n % w == 0:
            width = w
            break

    if width is not None:
        rows = n // width
        tile_rows = _pick_tile_rows(rows, width, itemsize,
                                    target_block_bytes, min_steps)
        out2d = _launch_2d(x.reshape(rows, width), tile_rows)
        return out2d.reshape(orig_shape)

    # Ragged fallback (size not divisible by 128): stream the flat 1-D view
    # through the same kernel with a partial final block.  No jnp.pad / slice
    # over the whole array -> HBM traffic stays at read + write, same as the
    # fast path.  Out-of-bounds writes of the final block are masked by Pallas.
    x1d = x.reshape(-1)
    unit = 128 * _sublane_multiple(itemsize)  # full vreg rows per dtype
    block = max(unit, (target_block_bytes // itemsize) // unit * unit)
    if min_steps > 1 and n > unit:
        cap = pl.cdiv(pl.cdiv(n, min_steps), unit) * unit
        block = min(block, max(unit, cap))
    if block >= n:
        block = n  # single full-extent block is always legal
    out1d = _launch_1d(x1d, block)
    return out1d.reshape(orig_shape)


if __name__ == "__main__":
    key = jax.random.PRNGKey(0)
    # Small NCHW input consistent with a conv-net activation.
    x = jax.random.normal(key, (2, 4, 16, 16), dtype=jnp.float32)

    y = square(x)
    y = jax.block_until_ready(y)

    # Correctness check against plain JAX reference.
    ref = x ** 2
    assert y.shape == x.shape and y.dtype == x.dtype
    assert jnp.allclose(y, ref, atol=0.0, rtol=1e-6)

    print("KERNEL_OK")
</pallas_src>

<mosaic_0001>
module attributes {stable_mosaic.version = 11 : i64} {
  func.func @_square_kernel(%arg0: i32, %arg1: memref<1x2048xf32, #tpu.memory_space<vmem>>, %arg2: memref<1x2048xf32, #tpu.memory_space<vmem>>) attributes {dimension_semantics = [#tpu.dimension_semantics<parallel>], iteration_bounds = array<i64: 1>, scalar_prefetch = 0 : i64, scratch_operands = 0 : i64, tpu.core_type = #tpu.core_type<tc>, window_params = [{transform_indices = @transform_0, window_bounds = array<i64: 1, 2048>}, {transform_indices = @transform_1, window_bounds = array<i64: 1, 2048>}]} {
    %c0 = arith.constant 0 : index
    %c0_0 = arith.constant 0 : index
    %0 = vector.load %arg1[%c0, %c0_0] : memref<1x2048xf32, #tpu.memory_space<vmem>>, vector<1x2048xf32>
    %1 = arith.mulf %0, %0 : vector<1x2048xf32>
    %c0_1 = arith.constant 0 : index
    %c0_2 = arith.constant 0 : index
    %2 = vector.load %arg2[%c0_1, %c0_2] : memref<1x2048xf32, #tpu.memory_space<vmem>>, vector<1x2048xf32>
    tpu.vector_store %arg2[%c0_1, %c0_2], %1 {strides = array<i32>} : memref<1x2048xf32, #tpu.memory_space<vmem>>, vector<1x2048xf32>,
    return
  }
  func.func @transform_0(%arg0: i32) -> (i32, i32) {
    %c0_i32 = arith.constant 0 : i32
    %c0_i32_0 = arith.constant 0 : i32
    return %arg0, %c0_i32 : i32, i32
  }
  func.func @transform_1(%arg0: i32) -> (i32, i32) {
    %c0_i32 = arith.constant 0 : i32
    %c0_i32_0 = arith.constant 0 : i32
    return %arg0, %c0_i32 : i32, i32
  }
}

</mosaic_0001>

<bundles_post_ra>
// kernel: tpu_custom_call.1
= control target key start
LH: loop header
LB: loop body
LE: loop exit
PB: predicated region body
PF: predicated region fallthrough
CT: control target
= control target key end

     0   :  { %6 = vsyncpa [#allocation3], 0  ;;  %s106_s0 = inlined_call_operand.hbm [shape: f32[1,2048], index: 0, kind: input, shape index: {}]   ;;  %s107_s1 = inlined_call_operand.hbm [shape: f32[1,2048], index: 1, kind: output, shape index: {}]  }
   0x1   :  { %7 = vsyncpa [#allocation4], 0  ;;  %s88_s6 = smov [#allocation2]  }
   0x2   :  { %s14_s7 = sshll.u32 %s88_s6, 4  ;;  %s15_s7 = int_to_ptr.vmem [resolvable:$true] %s14_s7 }
   0x3   :  { %s52_s8 = scalar_lea.vmem %s15_s7, 256  ;;  %p57_p1 = scmp.lt.s32.totalorder %s15_s7, %s15_s7 }
   0x4   :  { %p53_p0 = scmp.ne.s32.totalorder %s15_s7, %s52_s8  ;;  %p58_p2 = scmp.lt.s32.totalorder %s52_s8, %s52_s8 }
   0x6   :  { %p59_p3 = por %p58_p2, %p57_p1 }
   0x8   :  { %p60_p4 = pnand %p59_p3, %p53_p0 }
   0xa   :  { %63 = shalt.err (!%p60_p4)
}
   0xb   :  { %17 = dma.hbm_to_vmem [thread:$0]  %s106_s0, 256, %s15_s7, [#allocation3]  }
   0xc   :  { %84 = dma.done.wait [#allocation3], 256  }
   0xd   :  { %85 = vsyncadd [#allocation3], 4294967040  ;;  %s89_s11 = smov [#allocation5]   ;;  %v21_v0 = vld [vmem:[#allocation2] sm:$0xff]  ;;  %v22_v1 = vld [vmem:[#allocation2 + $0x8] sm:$0xff] }
   0xe   :  { %s33_s12 = sshll.u32 %s89_s11, 4  ;;  %v23_v2 = vmul.f32 %v21_v0, %v21_v0  ;;  %v24_v3 = vmul.f32 %v22_v1, %v22_v1  ;;  %s34_s12 = int_to_ptr.vmem [resolvable:$true] %s33_s12 }
   0xf   :  { %s64_s13 = scalar_lea.vmem %s34_s12, 256  ;;  %p69_p6 = scmp.lt.s32.totalorder %s34_s12, %s34_s12 }
  0x10   :  { %25 = vst [vmem:[#allocation5] sm:$0xff] %v23_v2  ;;  %26 = vst [vmem:[#allocation5 + $0x8] sm:$0xff] %v24_v3  ;;  %p65_p5 = scmp.ne.s32.totalorder %s34_s12, %s64_s13  ;;  %p70_p7 = scmp.lt.s32.totalorder %s64_s13, %s64_s13 }
  0x12   :  { %p71_p8 = por %p70_p7, %p69_p6 }
  0x14   :  { %p72_p9 = pnand %p71_p8, %p65_p5 }
  0x16   :  { %75 = shalt.err (!%p72_p9)
}
  0x17   :  { %36 = dma.vmem_to_hbm [thread:$0]  %s34_s12, 256, %s107_s1, [#allocation4]  }
  0x18   :  { %86 = dma.done.wait [#allocation4], 256  }
  0x19   :  { %87 = vsyncadd [#allocation4], 4294967040 }
  0x1a   :  { %40 = vsyncpa [#allocation3], 1 }
  0x1b   :  { %41 = vsyncpa [#allocation4], 1 }

</bundles_post_ra>
